<compile_context>
chip_gen: v6e
topology: v6e:2x2x1
jax: 0.10.0
libtpu: 0.0.40
codegen_flags: <defaults>
</compile_context>

<pallas_src>
import functools

import jax
import jax.numpy as jnp
from jax.experimental import pallas as pl
from jax.experimental.pallas import tpu as pltpu


def _bottleneck_kernel(x_ref, coords_ref, w1_ref, w2_ref, w3_ref, o_ref, *, H, W):
    # x_ref     : (Cin, H*W)      one image (batch dim squeezed away), f32
    # coords_ref: (2, H*W) int32  [row; col] spatial coordinates (precomputed)
    # w1_ref    : (Cout, Cin)     conv1 (1x1), bf16
    # w2_ref    : (Cout, 9*Cout)  conv2 (3x3, dilation=2), 9 taps fused on K, bf16
    # w3_ref    : (Cout, Cout)    conv3 (1x1), bf16
    # o_ref     : (Cout, H*W)     f32
    _, P = x_ref.shape

    # ---- conv1 (1x1, no bias) + ReLU : (Cout, Cin) @ (Cin, P) ----
    x = x_ref[...].astype(jnp.bfloat16)
    h1 = jnp.dot(w1_ref[...], x, preferred_element_type=jnp.float32)
    h1 = jnp.maximum(h1, 0.0)                                   # (Cout, P) f32

    # Spatial coordinates for the dilated-conv boundary masks (no in-kernel
    # integer division: row/col come in as a tiny precomputed input).
    row = coords_ref[0:1, :]                                    # (1, P) int32
    col = coords_ref[1:2, :]                                    # (1, P) int32

    # ---- conv2 (3x3, dilation=2, padding=2, no bias) + ReLU ----
    # Each tap (dy, dx) in {-2, 0, 2}^2:  tap[c, (y, x)] = h1[c, y+dy, x+dx] or 0.
    # Built as a lane rotation of the flattened image plus an in-bounds mask,
    # stacked along the sublane (channel) axis and contracted once with K=9*Cout.
    taps = []
    for ky in range(3):
        for kx in range(3):
            dy = (ky - 1) * 2
            dx = (kx - 1) * 2
            s = dy * W + dx                       # flattened source offset
            t = h1 if s == 0 else pltpu.roll(h1, shift=(-s) % P, axis=1)
            valid = None
            if dy != 0:
                valid = (row + dy >= 0) & (row + dy < H)
            if dx != 0:
                cv = (col + dx >= 0) & (col + dx < W)
                valid = cv if valid is None else (valid & cv)
            if valid is not None:
                t = jnp.where(valid, t, 0.0)      # (1,P) mask broadcasts over channels
            taps.append(t)
    tap_stack = jnp.concatenate(taps, axis=0)                   # (9*Cout, P) f32

    h2 = jnp.dot(w2_ref[...], tap_stack.astype(jnp.bfloat16),
                 preferred_element_type=jnp.float32)
    h2 = jnp.maximum(h2, 0.0)                                   # (Cout, P) f32

    # ---- conv3 (1x1, no bias) ----
    out = jnp.dot(w3_ref[...], h2.astype(jnp.bfloat16),
                  preferred_element_type=jnp.float32)
    o_ref[...] = out.astype(o_ref.dtype)


def bottleneck_pallas(x_nchw, w1_oihw, w2_oihw, w3_oihw):
    """x_nchw: (N, Cin, H, W) f32; weights in PyTorch OIHW layout (no bias)."""
    N, Cin, H, W = x_nchw.shape
    Cout = w1_oihw.shape[0]
    P = H * W

    # NCHW end-to-end: only free (contiguous) reshapes, no HBM transposes.
    x = x_nchw.reshape(N, Cin, P)

    # Precomputed [row; col] coordinates of the flattened spatial index.
    yy, xx = jnp.meshgrid(jnp.arange(H, dtype=jnp.int32),
                          jnp.arange(W, dtype=jnp.int32), indexing="ij")
    coords = jnp.stack([yy.reshape(-1), xx.reshape(-1)], axis=0)  # (2, P) int32

    # Weights as (Cout, K) matmul operands, bf16 for the MXU.
    w1 = w1_oihw[:, :, 0, 0].astype(jnp.bfloat16)                       # (Cout, Cin)
    w2 = jnp.transpose(w2_oihw, (0, 2, 3, 1)).reshape(Cout, 9 * Cout)
    w2 = w2.astype(jnp.bfloat16)                                        # (Cout, 9*Cout)
    w3 = w3_oihw[:, :, 0, 0].astype(jnp.bfloat16)                       # (Cout, Cout)

    kernel = functools.partial(_bottleneck_kernel, H=H, W=W)

    out = pl.pallas_call(
        kernel,
        out_shape=jax.ShapeDtypeStruct((N, Cout, P), jnp.float32),
        grid_spec=pltpu.PrefetchScalarGridSpec(
            num_scalar_prefetch=0,
            grid=(N,),
            in_specs=[
                pl.BlockSpec((pl.Squeezed(), Cin, P), lambda n: (n, 0, 0)),
                pl.BlockSpec((2, P), lambda n: (0, 0)),
                pl.BlockSpec((Cout, Cin), lambda n: (0, 0)),
                pl.BlockSpec((Cout, 9 * Cout), lambda n: (0, 0)),
                pl.BlockSpec((Cout, Cout), lambda n: (0, 0)),
            ],
            out_specs=pl.BlockSpec((pl.Squeezed(), Cout, P),
                                   lambda n: (n, 0, 0)),
        ),
        compiler_params=pltpu.CompilerParams(
            dimension_semantics=("parallel",)),
    )(x, coords, w1, w2, w3)

    return out.reshape(N, Cout, H, W)


def _reference(x_nchw, w1, w2, w3):
    """Pure-JAX f32 reference (lax conv) matching the PyTorch module."""
    dn = jax.lax.conv_dimension_numbers(x_nchw.shape, w1.shape,
                                        ("NCHW", "OIHW", "NCHW"))
    h = jax.lax.conv_general_dilated(x_nchw, w1, (1, 1), "VALID",
                                     dimension_numbers=dn)
    h = jnp.maximum(h, 0.0)
    h = jax.lax.conv_general_dilated(h, w2, (1, 1), [(2, 2), (2, 2)],
                                     rhs_dilation=(2, 2),
                                     dimension_numbers=dn)
    h = jnp.maximum(h, 0.0)
    h = jax.lax.conv_general_dilated(h, w3, (1, 1), "VALID",
                                     dimension_numbers=dn)
    return h


if __name__ == "__main__":
    key = jax.random.PRNGKey(0)
    kx, k1, k2, k3 = jax.random.split(key, 4)

    N, Cin, Cout, H, W = 2, 4, 8, 16, 16

    x = jax.random.normal(kx, (N, Cin, H, W), dtype=jnp.float32)
    # Deterministic synthetic weights (PyTorch OIHW layout), no bias per module.
    w1 = 0.1 * jax.random.normal(k1, (Cout, Cin, 1, 1), dtype=jnp.float32)
    w2 = 0.1 * jax.random.normal(k2, (Cout, Cout, 3, 3), dtype=jnp.float32)
    w3 = 0.1 * jax.random.normal(k3, (Cout, Cout, 1, 1), dtype=jnp.float32)

    out = jax.block_until_ready(bottleneck_pallas(x, w1, w2, w3))
    ref = jax.block_until_ready(_reference(x, w1, w2, w3))

    assert out.shape == (N, Cout, H, W)
    # bf16 matmul operands (f32 accumulation) -> bf16-level tolerance vs f32 reference.
    assert jnp.allclose(out, ref, atol=1e-2, rtol=1e-2), "mismatch vs reference"

    print("KERNEL_OK")
</pallas_src>

<mosaic_0001>
module attributes {stable_mosaic.version = 11 : i64} {
  func.func @_bottleneck_kernel(%arg0: i32, %arg1: memref<1x4x256xf32, #tpu.memory_space<vmem>>, %arg2: memref<2x256xi32, #tpu.memory_space<vmem>>, %arg3: memref<8x4xbf16, #tpu.memory_space<vmem>>, %arg4: memref<8x72xbf16, #tpu.memory_space<vmem>>, %arg5: memref<8x8xbf16, #tpu.memory_space<vmem>>, %arg6: memref<1x8x256xf32, #tpu.memory_space<vmem>>) attributes {dimension_semantics = [#tpu.dimension_semantics<parallel>], iteration_bounds = array<i64: 2>, scalar_prefetch = 0 : i64, scratch_operands = 0 : i64, tpu.core_type = #tpu.core_type<tc>, window_params = [{transform_indices = @transform_0, window_bounds = array<i64: 1, 4, 256>}, {pipeline_mode = #tpu.pipeline_mode<synchronous>, transform_indices = @transform_1, window_bounds = array<i64: 2, 256>}, {pipeline_mode = #tpu.pipeline_mode<synchronous>, transform_indices = @transform_2, window_bounds = array<i64: 8, 4>}, {pipeline_mode = #tpu.pipeline_mode<synchronous>, transform_indices = @transform_3, window_bounds = array<i64: 8, 72>}, {pipeline_mode = #tpu.pipeline_mode<synchronous>, transform_indices = @transform_4, window_bounds = array<i64: 8, 8>}, {transform_indices = @transform_5, window_bounds = array<i64: 1, 8, 256>}]} {
    %c0 = arith.constant 0 : index
    %c0_0 = arith.constant 0 : index
    %c0_1 = arith.constant 0 : index
    %0 = vector.load %arg1[%c0, %c0_0, %c0_1] : memref<1x4x256xf32, #tpu.memory_space<vmem>>, vector<1x4x256xf32>
    %1 = vector.shape_cast %0 : vector<1x4x256xf32> to vector<4x256xf32>
    %2 = arith.truncf %1 : vector<4x256xf32> to vector<4x256xbf16>
    %c0_2 = arith.constant 0 : index
    %c0_3 = arith.constant 0 : index
    %3 = vector.load %arg3[%c0_2, %c0_3] : memref<8x4xbf16, #tpu.memory_space<vmem>>, vector<8x4xbf16>
    %cst = arith.constant dense<0.000000e+00> : vector<8x256xf32>
    %4 = tpu.matmul %3, %2, %cst {dimension_numbers = #tpu.dot_dimension_numbers<[1], [0], [0], [1], [0, 0, 1, 1], [], []>} : vector<8x4xbf16>, vector<4x256xbf16>, vector<8x256xf32> -> vector<8x256xf32>
    %cst_4 = arith.constant 0.000000e+00 : f32
    %5 = vector.broadcast %cst_4 : f32 to vector<8x256xf32>
    %6 = arith.maximumf %4, %5 : vector<8x256xf32>
    %c0_5 = arith.constant 0 : index
    %c0_6 = arith.constant 0 : index
    %7 = vector.load %arg2[%c0_5, %c0_6] : memref<2x256xi32, #tpu.memory_space<vmem>>, vector<1x256xi32>
    %c1 = arith.constant 1 : index
    %c0_7 = arith.constant 0 : index
    %8 = vector.load %arg2[%c1, %c0_7] : memref<2x256xi32, #tpu.memory_space<vmem>>, vector<1x256xi32>
    %c34_i32 = arith.constant 34 : i32
    %9 = tpu.dynamic_rotate %6 by %c34_i32 dim 1 : vector<8x256xf32>, i32 -> vector<8x256xf32>
    %c-2_i32 = arith.constant -2 : i32
    %10 = vector.broadcast %c-2_i32 : i32 to vector<1x256xi32>
    %11 = arith.addi %7, %10 : vector<1x256xi32>
    %c0_i32 = arith.constant 0 : i32
    %12 = vector.broadcast %c0_i32 : i32 to vector<1x256xi32>
    %13 = arith.cmpi sge, %11, %12 : vector<1x256xi32>
    %c-2_i32_8 = arith.constant -2 : i32
    %14 = vector.broadcast %c-2_i32_8 : i32 to vector<1x256xi32>
    %15 = arith.addi %7, %14 : vector<1x256xi32>
    %c16_i32 = arith.constant 16 : i32
    %16 = vector.broadcast %c16_i32 : i32 to vector<1x256xi32>
    %17 = arith.cmpi slt, %15, %16 : vector<1x256xi32>
    %18 = arith.andi %13, %17 : vector<1x256xi1>
    %c-2_i32_9 = arith.constant -2 : i32
    %19 = vector.broadcast %c-2_i32_9 : i32 to vector<1x256xi32>
    %20 = arith.addi %8, %19 : vector<1x256xi32>
    %c0_i32_10 = arith.constant 0 : i32
    %21 = vector.broadcast %c0_i32_10 : i32 to vector<1x256xi32>
    %22 = arith.cmpi sge, %20, %21 : vector<1x256xi32>
    %c-2_i32_11 = arith.constant -2 : i32
    %23 = vector.broadcast %c-2_i32_11 : i32 to vector<1x256xi32>
    %24 = arith.addi %8, %23 : vector<1x256xi32>
    %c16_i32_12 = arith.constant 16 : i32
    %25 = vector.broadcast %c16_i32_12 : i32 to vector<1x256xi32>
    %26 = arith.cmpi slt, %24, %25 : vector<1x256xi32>
    %27 = arith.andi %22, %26 : vector<1x256xi1>
    %28 = arith.andi %18, %27 : vector<1x256xi1>
    %cst_13 = arith.constant 0.000000e+00 : f32
    %29 = vector.shape_cast %28 : vector<1x256xi1> to vector<1x256xi1>
    %30 = vector.broadcast %29 : vector<1x256xi1> to vector<8x256xi1>
    %31 = vector.broadcast %cst_13 : f32 to vector<8x256xf32>
    %32 = arith.select %30, %9, %31 : vector<8x256xi1>, vector<8x256xf32>
    %c32_i32 = arith.constant 32 : i32
    %33 = tpu.dynamic_rotate %6 by %c32_i32 dim 1 : vector<8x256xf32>, i32 -> vector<8x256xf32>
    %c-2_i32_14 = arith.constant -2 : i32
    %34 = vector.broadcast %c-2_i32_14 : i32 to vector<1x256xi32>
    %35 = arith.addi %7, %34 : vector<1x256xi32>
    %c0_i32_15 = arith.constant 0 : i32
    %36 = vector.broadcast %c0_i32_15 : i32 to vector<1x256xi32>
    %37 = arith.cmpi sge, %35, %36 : vector<1x256xi32>
    %c-2_i32_16 = arith.constant -2 : i32
    %38 = vector.broadcast %c-2_i32_16 : i32 to vector<1x256xi32>
    %39 = arith.addi %7, %38 : vector<1x256xi32>
    %c16_i32_17 = arith.constant 16 : i32
    %40 = vector.broadcast %c16_i32_17 : i32 to vector<1x256xi32>
    %41 = arith.cmpi slt, %39, %40 : vector<1x256xi32>
    %42 = arith.andi %37, %41 : vector<1x256xi1>
    %cst_18 = arith.constant 0.000000e+00 : f32
    %43 = vector.shape_cast %42 : vector<1x256xi1> to vector<1x256xi1>
    %44 = vector.broadcast %43 : vector<1x256xi1> to vector<8x256xi1>
    %45 = vector.broadcast %cst_18 : f32 to vector<8x256xf32>
    %46 = arith.select %44, %33, %45 : vector<8x256xi1>, vector<8x256xf32>
    %c30_i32 = arith.constant 30 : i32
    %47 = tpu.dynamic_rotate %6 by %c30_i32 dim 1 : vector<8x256xf32>, i32 -> vector<8x256xf32>
    %c-2_i32_19 = arith.constant -2 : i32
    %48 = vector.broadcast %c-2_i32_19 : i32 to vector<1x256xi32>
    %49 = arith.addi %7, %48 : vector<1x256xi32>
    %c0_i32_20 = arith.constant 0 : i32
    %50 = vector.broadcast %c0_i32_20 : i32 to vector<1x256xi32>
    %51 = arith.cmpi sge, %49, %50 : vector<1x256xi32>
    %c-2_i32_21 = arith.constant -2 : i32
    %52 = vector.broadcast %c-2_i32_21 : i32 to vector<1x256xi32>
    %53 = arith.addi %7, %52 : vector<1x256xi32>
    %c16_i32_22 = arith.constant 16 : i32
    %54 = vector.broadcast %c16_i32_22 : i32 to vector<1x256xi32>
    %55 = arith.cmpi slt, %53, %54 : vector<1x256xi32>
    %56 = arith.andi %51, %55 : vector<1x256xi1>
    %c2_i32 = arith.constant 2 : i32
    %57 = vector.broadcast %c2_i32 : i32 to vector<1x256xi32>
    %58 = arith.addi %8, %57 : vector<1x256xi32>
    %c0_i32_23 = arith.constant 0 : i32
    %59 = vector.broadcast %c0_i32_23 : i32 to vector<1x256xi32>
    %60 = arith.cmpi sge, %58, %59 : vector<1x256xi32>
    %c2_i32_24 = arith.constant 2 : i32
    %61 = vector.broadcast %c2_i32_24 : i32 to vector<1x256xi32>
    %62 = arith.addi %8, %61 : vector<1x256xi32>
    %c16_i32_25 = arith.constant 16 : i32
    %63 = vector.broadcast %c16_i32_25 : i32 to vector<1x256xi32>
    %64 = arith.cmpi slt, %62, %63 : vector<1x256xi32>
    %65 = arith.andi %60, %64 : vector<1x256xi1>
    %66 = arith.andi %56, %65 : vector<1x256xi1>
    %cst_26 = arith.constant 0.000000e+00 : f32
    %67 = vector.shape_cast %66 : vector<1x256xi1> to vector<1x256xi1>
    %68 = vector.broadcast %67 : vector<1x256xi1> to vector<8x256xi1>
    %69 = vector.broadcast %cst_26 : f32 to vector<8x256xf32>
    %70 = arith.select %68, %47, %69 : vector<8x256xi1>, vector<8x256xf32>
    %c2_i32_27 = arith.constant 2 : i32
    %71 = tpu.dynamic_rotate %6 by %c2_i32_27 dim 1 : vector<8x256xf32>, i32 -> vector<8x256xf32>
    %c-2_i32_28 = arith.constant -2 : i32
    %72 = vector.broadcast %c-2_i32_28 : i32 to vector<1x256xi32>
    %73 = arith.addi %8, %72 : vector<1x256xi32>
    %c0_i32_29 = arith.constant 0 : i32
    %74 = vector.broadcast %c0_i32_29 : i32 to vector<1x256xi32>
    %75 = arith.cmpi sge, %73, %74 : vector<1x256xi32>
    %c-2_i32_30 = arith.constant -2 : i32
    %76 = vector.broadcast %c-2_i32_30 : i32 to vector<1x256xi32>
    %77 = arith.addi %8, %76 : vector<1x256xi32>
    %c16_i32_31 = arith.constant 16 : i32
    %78 = vector.broadcast %c16_i32_31 : i32 to vector<1x256xi32>
    %79 = arith.cmpi slt, %77, %78 : vector<1x256xi32>
    %80 = arith.andi %75, %79 : vector<1x256xi1>
    %cst_32 = arith.constant 0.000000e+00 : f32
    %81 = vector.shape_cast %80 : vector<1x256xi1> to vector<1x256xi1>
    %82 = vector.broadcast %81 : vector<1x256xi1> to vector<8x256xi1>
    %83 = vector.broadcast %cst_32 : f32 to vector<8x256xf32>
    %84 = arith.select %82, %71, %83 : vector<8x256xi1>, vector<8x256xf32>
    %c254_i32 = arith.constant 254 : i32
    %85 = tpu.dynamic_rotate %6 by %c254_i32 dim 1 : vector<8x256xf32>, i32 -> vector<8x256xf32>
    %c2_i32_33 = arith.constant 2 : i32
    %86 = vector.broadcast %c2_i32_33 : i32 to vector<1x256xi32>
    %87 = arith.addi %8, %86 : vector<1x256xi32>
    %c0_i32_34 = arith.constant 0 : i32
    %88 = vector.broadcast %c0_i32_34 : i32 to vector<1x256xi32>
    %89 = arith.cmpi sge, %87, %88 : vector<1x256xi32>
    %c2_i32_35 = arith.constant 2 : i32
    %90 = vector.broadcast %c2_i32_35 : i32 to vector<1x256xi32>
    %91 = arith.addi %8, %90 : vector<1x256xi32>
    %c16_i32_36 = arith.constant 16 : i32
    %92 = vector.broadcast %c16_i32_36 : i32 to vector<1x256xi32>
    %93 = arith.cmpi slt, %91, %92 : vector<1x256xi32>
    %94 = arith.andi %89, %93 : vector<1x256xi1>
    %cst_37 = arith.constant 0.000000e+00 : f32
    %95 = vector.shape_cast %94 : vector<1x256xi1> to vector<1x256xi1>
    %96 = vector.broadcast %95 : vector<1x256xi1> to vector<8x256xi1>
    %97 = vector.broadcast %cst_37 : f32 to vector<8x256xf32>
    %98 = arith.select %96, %85, %97 : vector<8x256xi1>, vector<8x256xf32>
    %c226_i32 = arith.constant 226 : i32
    %99 = tpu.dynamic_rotate %6 by %c226_i32 dim 1 : vector<8x256xf32>, i32 -> vector<8x256xf32>
    %c2_i32_38 = arith.constant 2 : i32
    %100 = vector.broadcast %c2_i32_38 : i32 to vector<1x256xi32>
    %101 = arith.addi %7, %100 : vector<1x256xi32>
    %c0_i32_39 = arith.constant 0 : i32
    %102 = vector.broadcast %c0_i32_39 : i32 to vector<1x256xi32>
    %103 = arith.cmpi sge, %101, %102 : vector<1x256xi32>
    %c2_i32_40 = arith.constant 2 : i32
    %104 = vector.broadcast %c2_i32_40 : i32 to vector<1x256xi32>
    %105 = arith.addi %7, %104 : vector<1x256xi32>
    %c16_i32_41 = arith.constant 16 : i32
    %106 = vector.broadcast %c16_i32_41 : i32 to vector<1x256xi32>
    %107 = arith.cmpi slt, %105, %106 : vector<1x256xi32>
    %108 = arith.andi %103, %107 : vector<1x256xi1>
    %c-2_i32_42 = arith.constant -2 : i32
    %109 = vector.broadcast %c-2_i32_42 : i32 to vector<1x256xi32>
    %110 = arith.addi %8, %109 : vector<1x256xi32>
    %c0_i32_43 = arith.constant 0 : i32
    %111 = vector.broadcast %c0_i32_43 : i32 to vector<1x256xi32>
    %112 = arith.cmpi sge, %110, %111 : vector<1x256xi32>
    %c-2_i32_44 = arith.constant -2 : i32
    %113 = vector.broadcast %c-2_i32_44 : i32 to vector<1x256xi32>
    %114 = arith.addi %8, %113 : vector<1x256xi32>
    %c16_i32_45 = arith.constant 16 : i32
    %115 = vector.broadcast %c16_i32_45 : i32 to vector<1x256xi32>
    %116 = arith.cmpi slt, %114, %115 : vector<1x256xi32>
    %117 = arith.andi %112, %116 : vector<1x256xi1>
    %118 = arith.andi %108, %117 : vector<1x256xi1>
    %cst_46 = arith.constant 0.000000e+00 : f32
    %119 = vector.shape_cast %118 : vector<1x256xi1> to vector<1x256xi1>
    %120 = vector.broadcast %119 : vector<1x256xi1> to vector<8x256xi1>
    %121 = vector.broadcast %cst_46 : f32 to vector<8x256xf32>
    %122 = arith.select %120, %99, %121 : vector<8x256xi1>, vector<8x256xf32>
    %c224_i32 = arith.constant 224 : i32
    %123 = tpu.dynamic_rotate %6 by %c224_i32 dim 1 : vector<8x256xf32>, i32 -> vector<8x256xf32>
    %c2_i32_47 = arith.constant 2 : i32
    %124 = vector.broadcast %c2_i32_47 : i32 to vector<1x256xi32>
    %125 = arith.addi %7, %124 : vector<1x256xi32>
    %c0_i32_48 = arith.constant 0 : i32
    %126 = vector.broadcast %c0_i32_48 : i32 to vector<1x256xi32>
    %127 = arith.cmpi sge, %125, %126 : vector<1x256xi32>
    %c2_i32_49 = arith.constant 2 : i32
    %128 = vector.broadcast %c2_i32_49 : i32 to vector<1x256xi32>
    %129 = arith.addi %7, %128 : vector<1x256xi32>
    %c16_i32_50 = arith.constant 16 : i32
    %130 = vector.broadcast %c16_i32_50 : i32 to vector<1x256xi32>
    %131 = arith.cmpi slt, %129, %130 : vector<1x256xi32>
    %132 = arith.andi %127, %131 : vector<1x256xi1>
    %cst_51 = arith.constant 0.000000e+00 : f32
    %133 = vector.shape_cast %132 : vector<1x256xi1> to vector<1x256xi1>
    %134 = vector.broadcast %133 : vector<1x256xi1> to vector<8x256xi1>
    %135 = vector.broadcast %cst_51 : f32 to vector<8x256xf32>
    %136 = arith.select %134, %123, %135 : vector<8x256xi1>, vector<8x256xf32>
    %c222_i32 = arith.constant 222 : i32
    %137 = tpu.dynamic_rotate %6 by %c222_i32 dim 1 : vector<8x256xf32>, i32 -> vector<8x256xf32>
    %c2_i32_52 = arith.constant 2 : i32
    %138 = vector.broadcast %c2_i32_52 : i32 to vector<1x256xi32>
    %139 = arith.addi %7, %138 : vector<1x256xi32>
    %c0_i32_53 = arith.constant 0 : i32
    %140 = vector.broadcast %c0_i32_53 : i32 to vector<1x256xi32>
    %141 = arith.cmpi sge, %139, %140 : vector<1x256xi32>
    %c2_i32_54 = arith.constant 2 : i32
    %142 = vector.broadcast %c2_i32_54 : i32 to vector<1x256xi32>
    %143 = arith.addi %7, %142 : vector<1x256xi32>
    %c16_i32_55 = arith.constant 16 : i32
    %144 = vector.broadcast %c16_i32_55 : i32 to vector<1x256xi32>
    %145 = arith.cmpi slt, %143, %144 : vector<1x256xi32>
    %146 = arith.andi %141, %145 : vector<1x256xi1>
    %c2_i32_56 = arith.constant 2 : i32
    %147 = vector.broadcast %c2_i32_56 : i32 to vector<1x256xi32>
    %148 = arith.addi %8, %147 : vector<1x256xi32>
    %c0_i32_57 = arith.constant 0 : i32
    %149 = vector.broadcast %c0_i32_57 : i32 to vector<1x256xi32>
    %150 = arith.cmpi sge, %148, %149 : vector<1x256xi32>
    %c2_i32_58 = arith.constant 2 : i32
    %151 = vector.broadcast %c2_i32_58 : i32 to vector<1x256xi32>
    %152 = arith.addi %8, %151 : vector<1x256xi32>
    %c16_i32_59 = arith.constant 16 : i32
    %153 = vector.broadcast %c16_i32_59 : i32 to vector<1x256xi32>
    %154 = arith.cmpi slt, %152, %153 : vector<1x256xi32>
    %155 = arith.andi %150, %154 : vector<1x256xi1>
    %156 = arith.andi %146, %155 : vector<1x256xi1>
    %cst_60 = arith.constant 0.000000e+00 : f32
    %157 = vector.shape_cast %156 : vector<1x256xi1> to vector<1x256xi1>
    %158 = vector.broadcast %157 : vector<1x256xi1> to vector<8x256xi1>
    %159 = vector.broadcast %cst_60 : f32 to vector<8x256xf32>
    %160 = arith.select %158, %137, %159 : vector<8x256xi1>, vector<8x256xf32>
    %161 = tpu.concatenate %32, %46, %70, %84, %6, %98, %122, %136, %160 in 0 : vector<8x256xf32>, vector<8x256xf32>, vector<8x256xf32>, vector<8x256xf32>, vector<8x256xf32>, vector<8x256xf32>, vector<8x256xf32>, vector<8x256xf32>, vector<8x256xf32> -> vector<72x256xf32>
    %c0_61 = arith.constant 0 : index
    %c0_62 = arith.constant 0 : index
    %162 = vector.load %arg4[%c0_61, %c0_62] : memref<8x72xbf16, #tpu.memory_space<vmem>>, vector<8x72xbf16>
    %163 = arith.truncf %161 : vector<72x256xf32> to vector<72x256xbf16>
    %cst_63 = arith.constant dense<0.000000e+00> : vector<8x256xf32>
    %164 = tpu.matmul %162, %163, %cst_63 {dimension_numbers = #tpu.dot_dimension_numbers<[1], [0], [0], [1], [0, 0, 1, 1], [], []>} : vector<8x72xbf16>, vector<72x256xbf16>, vector<8x256xf32> -> vector<8x256xf32>
    %cst_64 = arith.constant 0.000000e+00 : f32
    %165 = vector.broadcast %cst_64 : f32 to vector<8x256xf32>
    %166 = arith.maximumf %164, %165 : vector<8x256xf32>
    %c0_65 = arith.constant 0 : index
    %c0_66 = arith.constant 0 : index
    %167 = vector.load %arg5[%c0_65, %c0_66] : memref<8x8xbf16, #tpu.memory_space<vmem>>, vector<8x8xbf16>
    %168 = arith.truncf %166 : vector<8x256xf32> to vector<8x256xbf16>
    %cst_67 = arith.constant dense<0.000000e+00> : vector<8x256xf32>
    %169 = tpu.matmul %167, %168, %cst_67 {dimension_numbers = #tpu.dot_dimension_numbers<[1], [0], [0], [1], [0, 0, 1, 1], [], []>} : vector<8x8xbf16>, vector<8x256xbf16>, vector<8x256xf32> -> vector<8x256xf32>
    %c0_68 = arith.constant 0 : index
    %c0_69 = arith.constant 0 : index
    %c0_70 = arith.constant 0 : index
    %170 = vector.load %arg6[%c0_68, %c0_69, %c0_70] : memref<1x8x256xf32, #tpu.memory_space<vmem>>, vector<1x8x256xf32>
    %171 = vector.shape_cast %170 : vector<1x8x256xf32> to vector<8x256xf32>
    %172 = vector.shape_cast %169 : vector<8x256xf32> to vector<1x8x256xf32>
    tpu.vector_store %arg6[%c0_68, %c0_69, %c0_70], %172 {strides = array<i32>} : memref<1x8x256xf32, #tpu.memory_space<vmem>>, vector<1x8x256xf32>,
    return
  }
  func.func @transform_0(%arg0: i32) -> (i32, i32, i32) {
    %c0_i32 = arith.constant 0 : i32
    %c0_i32_0 = arith.constant 0 : i32
    %c0_i32_1 = arith.constant 0 : i32
    return %arg0, %c0_i32, %c0_i32_0 : i32, i32, i32
  }
  func.func @transform_1(%arg0: i32) -> (i32, i32) {
    %c0_i32 = arith.constant 0 : i32
    %c0_i32_0 = arith.constant 0 : i32
    %c0_i32_1 = arith.constant 0 : i32
    return %c0_i32, %c0_i32_0 : i32, i32
  }
  func.func @transform_2(%arg0: i32) -> (i32, i32) {
    %c0_i32 = arith.constant 0 : i32
    %c0_i32_0 = arith.constant 0 : i32
    %c0_i32_1 = arith.constant 0 : i32
    return %c0_i32, %c0_i32_0 : i32, i32
  }
  func.func @transform_3(%arg0: i32) -> (i32, i32) {
    %c0_i32 = arith.constant 0 : i32
    %c0_i32_0 = arith.constant 0 : i32
    %c0_i32_1 = arith.constant 0 : i32
    return %c0_i32, %c0_i32_0 : i32, i32
  }
  func.func @transform_4(%arg0: i32) -> (i32, i32) {
    %c0_i32 = arith.constant 0 : i32
    %c0_i32_0 = arith.constant 0 : i32
    %c0_i32_1 = arith.constant 0 : i32
    return %c0_i32, %c0_i32_0 : i32, i32
  }
  func.func @transform_5(%arg0: i32) -> (i32, i32, i32) {
    %c0_i32 = arith.constant 0 : i32
    %c0_i32_0 = arith.constant 0 : i32
    %c0_i32_1 = arith.constant 0 : i32
    return %arg0, %c0_i32, %c0_i32_0 : i32, i32, i32
  }
}

</mosaic_0001>

<bundles_post_ra>
// kernel: tpu_custom_call.1
= control target key start
LH: loop header
LB: loop body
LE: loop exit
PB: predicated region body
PF: predicated region fallthrough
CT: control target
= control target key end

     0   :  { %10 = vsyncpa [#allocation3], 0  ;;  %s1354_s0 = inlined_call_operand.hbm [shape: f32[2,4,256], index: 0, kind: input, shape index: {}]   ;;  %s1355_s1 = inlined_call_operand.vmem [shape: s32[2,256], index: 1, kind: input, shape index: {}]   ;;  %s1356_s2 = inlined_call_operand.vmem [shape: bf16[8,4], index: 2, kind: input, shape index: {}]   ;;  %s1357_s3 = inlined_call_operand.vmem [shape: bf16[8,72], index: 3, kind: input, shape index: {}]   ;;  %s1358_s4 = inlined_call_operand.vmem [shape: bf16[8,8], index: 4, kind: input, shape index: {}]   ;;  %s1359_s5 = inlined_call_operand.hbm [shape: f32[2,8,256], index: 5, kind: output, shape index: {}]  }
   0x1   :  { %12 = vsyncpa [#allocation3 + $0x1], 0 }
   0x2   :  { %13 = vsyncpa [#allocation4], 0 }
   0x3   :  { %15 = vsyncpa [#allocation4 + $0x1], 0  ;;  %s974_s18 = smov 0   ;;  %s976_s19 = smov 0  }
   0x4   :  { %s978_s20 = smov 0   ;;  %s980_s21 = smov 0  }
   0x5 LB: > { %s995_s22 = sadd.s32 4294967295, %s930_s21   ;;  %s694_s23 = sadd.s32 4294967294, %s930_s21   ;;  %s930_s21 = sphi %s980_s21, %s1408_s21   ;;  %s926_s20 = sphi %s978_s20, %s1407_s20   ;;  %s922_s19 = sphi %s976_s19, %s1406_s19   ;;  %s918_s18 = sphi %s974_s18, %s1405_s18  }
   0x6   : > { %s999_s24 = sadd.s32 1, %s930_s21   ;;  %s28_s25 = sadd.s32 1, %s926_s20 }
   0x7   : > { %s25_s26 = ssub.s32 %s930_s21, %s999_s24  ;;  %p35_p0 = scmp.ne.s32.totalorder %s926_s20, %s922_s19 }
   0x8   : > { %p26_p1 = scmp.eq.s32.totalorder %s25_s26, 0  ;;  %p36_p2 = scmp.eq.s32.totalorder %s930_s21, 0 }
   0x9   : > { %p41_p3 = scmp.ne.s32.totalorder %s922_s19, %s918_s18  ;;  %p42_p4 = scmp.eq.s32.totalorder %s995_s22, 0 }
   0xa   : > { %s1011_s27 = scalar_select %p26_p1, %s926_s20, %s28_s25  }
   0xb   : > { %p1013_p5 = por %p36_p2, %p35_p0  ;;  %p1017_p6 = por %p42_p4, %p41_p3 }
   0xc   : > { %p149_p7 = scmp.eq.s32.totalorder %s995_s22, 1  ;;  %p155_p8 = scmp.eq.s32.totalorder %s694_s23, 1 }
   0xd   : > { %s1363_s29 = scalar_select %p1017_p6, 1, 0 }
   0xe   : > { %p753_p10 = scmp.lt.s32.totalorder %s930_s21, 2  ;;  %p1024_p11 = por %p149_p7, %p35_p0 }
   0xf   : > { %p1028_p12 = por %p155_p8, %p41_p3  ;;  %s187_s7 = sand.u32 1, %s926_s20  }
  0x10   : > { %s1364_s30 = scalar_select %p1024_p11, 1, 0 }
  0x11   : > { %s1365_s6 = scalar_select %p1028_p12, 1, 0 }
  0x12   : > { %s739_s8 = sshll.u32 %s930_s21, 7  ;;  %s697_s9 = sshll.u32 %s187_s7, 3 }
  0x13   : > { %s1037_s12 = scalar_lea.hbm %s1354_s0, %s739_s8  ;;  %s191_s13 = scalar_lea.vmem [#allocation2], %s697_s9 }
  0x14   : > { %s199_s14 = sshll.u32 %s191_s13, 4  ;;  %p1041_p13 = pnand %p753_p10, %p1013_p5  ;;  %s1045_s14 = int_to_ptr.vmem [resolvable:$true] %s199_s14 }
  0x15   : > { %s188_s16 = scalar_lea.sflag [#allocation3], %s187_s7  ;;  %s838_s17 = scalar_lea.hbm %s1037_s12, 128 }
  0x16   : > { %p839_p2 = scmp.ne.s32.totalorder %s1037_s12, %s838_s17  ;;  %p840_p3 = pneg %p1041_p13 }
  0x17   : > { %s843_s26 = scalar_lea.hbm %s1354_s0, 256  ;;  %p844_p5 = scmp.lt.s32.totalorder %s1037_s12, %s1354_s0 }
  0x18   : > { %p841_p4 = pnand %p840_p3, %p839_p2  ;;  %p845_p8 = scmp.lt.s32.totalorder %s843_s26, %s838_s17 }
  0x1a   : > { %p842_p7 = pneg %p841_p4  ;;  %p846_p10 = por %p845_p8, %p844_p5 }
  0x1c   : > { %p847_p9 = pnand %p846_p10, %p842_p7 }
  0x1e   : > { %850 = shalt.err (!%p847_p9)
}
  0x1f   : > { %s851_s7 = scalar_lea.vmem %s1045_s14, 128  ;;  %s932_s9 = smov [#allocation2]  }
  0x20   : > { %p852_p0 = scmp.ne.s32.totalorder %s1045_s14, %s851_s7  ;;  %s856_s10 = sshll.u32 %s932_s9, 4  ;;  %s857_s10 = int_to_ptr.vmem [resolvable:$false] %s856_s10 }
  0x21   : > { %s858_s11 = scalar_lea.vmem %s857_s10, 256  ;;  %p859_p4 = scmp.lt.s32.totalorder %s1045_s14, %s857_s10 }
  0x22   : > { %p854_p1 = pnand %p852_p0, %p840_p3  ;;  %p860_p12 = scmp.lt.s32.totalorder %s858_s11, %s851_s7 }
  0x24   : > { %p855_p2 = pneg %p854_p1  ;;  %p861_p11 = por %p860_p12, %p859_p4 }
  0x26   : > { %p862_p6 = pnand %p861_p11, %p855_p2 }
  0x28   : > { %865 = shalt.err (!%p862_p6)
}
  0x29   : > { %748 = dma.hbm_to_vmem [thread:$0]  (!%p1041_p13), %s1037_s12, 128, %s1045_s14, %s188_s16  }
  0x2a   : > { %p1367_p9 = scmp.lt.s32.totalorder %s930_s21, 3  ;;  %p1368_p7 = scmp.ge.s32.totalorder %s930_s21, 1 }
  0x2c   : > { %p205_p0 = pnand %p1368_p7, %p1367_p9 }
  0x2d   : > { %s1072_s13 = sand.u32 (!%p205_p0), 1, %s922_s19   ;;  %p1369_p6 = scmp.ne.s32.totalorder (!%p205_p0), %s1363_s29, 0 }
  0x2e   : > { %208 = sbr.rel (%p205_p0) target bundleno = 813 (0x32d), region = 40  ;;  %s701_s17 = sshll.u32 (!%p205_p0), %s1072_s13, 3 }
  0x2f   : > { %s211_s23 = scalar_lea.sflag (!%p205_p0), [#allocation3], %s1072_s13  ;;  %s214_s25 = scalar_lea.vmem (!%p205_p0), [#allocation2], %s701_s17 }
  0x33   : > { %909 = dma.done.wait (%p1369_p6), %s211_s23, 128  }
  0x34   : > { %911 = vsyncadd (%p1369_p6), %s211_s23, 4294967168  ;;  %v933_v0 = vmov 0   ;;  %v242_v1 = vld [vmem:[%s214_s25] sm:$0xff]  ;;  %vm253_vm0 = vcmask 1041408   ;;  %vm249_vm1 = vcmask 31744   ;;  %s934_s29 = smov 96   ;;  %v310_v19 = vlaneseq }
  0x35   : > { %292 = vmatprep.mubr.bf16.mxu0 %v933_v0  ;;  %542 = vmatprep.mubr.bf16.mxu1 %v933_v0  ;;  %v244_v2 = vcombine.high %v242_v1, %v242_v1  ;;  %v246_v3 = vpack.c.bf16 %v242_v1, %v242_v1  ;;  %v248_v6 = vld [vmem:[%s1356_s2] sm:$0xf]  ;;  %s935_s15 = smov 94   ;;  %s936_s16 = smov 126  }
  0x36   : > { %s937_s26 = smov 98   ;;  %s938_s28 = smov 2   ;;  %v705_v14 = vld [vmem:[%s1355_s1 + $0x1] ss:$2 sm:$0x3]  ;;  %v326_v21 = vshrl.u32 %v310_v19, 7 }
  0x37   : > { %v247_v4 = vpack.c.bf16 %v244_v2, %v244_v2  ;;  %v255_v5 = vsel %vm253_vm0, %v246_v3, 0  ;;  %s939_s8 = smov 30   ;;  %s940_s7 = smov 32   ;;  %v303_v15 = vld [vmem:[%s1355_s1] ss:$2 sm:$0x3] }
  0x38   : > { %s941_s9 = smov 34   ;;  %v364_v16 = vadd.s32 2, %v705_v14  ;;  %v429_v17 = vadd.s32 2, %v303_v15  ;;  %v319_v18 = vadd.s32 4294967294, %v705_v14  ;;  %v1112_v23 = vsub.s32 1, %v326_v21  ;;  %s610_s10 = scalar_lea.sflag [#allocation4], %s1072_s13 }
  0x39   : > { %703 = vmatprep.subr.msk.bf16.mxu0 %vm253_vm0, %v247_v4  ;;  %v1114_v24 = vsub.s32 0, %v326_v21  ;;  %v315_v26 = vadd.s32 4294967294, %v303_v15  ;;  %v1119_v27 = vand.u32 127, %v310_v19  ;;  %v488_v55 = vld [vmem:[%s1357_s3] sm:$0xf]  ;;  %p1402_p12 = scmp.ne.s32.totalorder %s1364_s30, 0 }
  0x3a   : > { %275 = vmatpush1.bf16.msra.mxu0 %v255_v5  ;;  %vm365_vm2 = vcmp.ge.s32.totalorder %v364_v16, 0  ;;  %vm366_vm3 = vcmp.lt.s32.totalorder %v364_v16, 16  ;;  %vm430_vm4 = vcmp.ge.s32.totalorder %v429_v17, 0  ;;  %vm431_vm5 = vcmp.lt.s32.totalorder %v429_v17, 16 }
  0x3b   : > { %vm1102_vm6 = vmand %vm365_vm2, %vm366_vm3  ;;  %vm320_vm7 = vcmp.ge.s32.totalorder %v319_v18, 0  ;;  %vm321_vm8 = vcmp.lt.s32.totalorder %v319_v18, 16  ;;  %vm316_vm13 = vcmp.ge.s32.totalorder %v315_v26, 0  ;;  %vm317_vm14 = vcmp.lt.s32.totalorder %v315_v26, 16 }
  0x3c   : > { %vm432_vm9 = vmand %vm430_vm4, %vm431_vm5  ;;  %vm451_vm15 = vcmp.lt.s32.totalorder %v1119_v27, 96  ;;  %vm406_vm0 = vcmp.lt.s32.totalorder %v1119_v27, 126  ;;  %vm426_vm5 = vcmp.lt.s32.totalorder %v1119_v27, 98  ;;  %v409_v43 = vsel %vm1102_vm6, 1, %v933_v0 }
  0x3d   : > { %704 = vmatmul.mubr.msk.bf16.vlgmr.msra.gmra.mxu0 %vm249_vm1, %v248_v6  ;;  %vm1106_vm10 = vmand %vm320_vm7, %vm321_vm8  ;;  %v454_v29 = vsel %vm432_vm9, 1, %v933_v0  ;;  %vm471_vm1 = vcmp.lt.s32.totalorder %v1119_v27, 94  ;;  %vm503_vm7 = vcmask 1043456   ;;  %v417_v56 = vrot.slane %v409_v43, %v1112_v23 }
  0x3e   : > { %598 = vmatprep.mubr.bf16.mxu0 %v933_v0  ;;  %vm474_vm11 = vmand %vm432_vm9, %vm1102_vm6  ;;  %v462_v33 = vrot.slane %v454_v29, %v1112_v23  ;;  %v458_v39 = vrot.slane %v454_v29, %v1114_v24  ;;  %v389_v59 = vsel %vm1106_vm10, 1, %v933_v0  ;;  %v413_v62 = vrot.slane %v409_v43, %v1114_v24 }
  0x3f   : > { %vm433_vm12 = vmand %vm432_vm9, %vm1106_vm10  ;;  %v475_v25 = vsel %vm474_vm11, 1, %v933_v0 }
  0x40   : > { %v434_v28 = vsel %vm433_vm12, 1, %v933_v0  ;;  %v483_v30 = vrot.slane %v475_v25, %v1112_v23  ;;  %v479_v31 = vrot.slane %v475_v25, %v1114_v24  ;;  %vm1140_vm4 = vmand %vm316_vm13, %vm317_vm14  ;;  %vm1152_vm9 = vcmp.eq.s32.totalorder %v462_v33, 1 }
  0x41   : > { %v442_v32 = vrot.slane %v434_v28, %v1112_v23  ;;  %v438_v34 = vrot.slane %v434_v28, %v1114_v24  ;;  %vm368_vm12 = vmand %vm1140_vm4, %vm1102_vm6  ;;  %vm1172_vm13 = vcmp.eq.s32.totalorder %v458_v39, 1  ;;  %vm1191_vm14 = vcmp.eq.s32.totalorder %v417_v56, 1 }
  0x42   : > { %vm1131_vm2 = vcmp.eq.s32.totalorder %v483_v30, 1  ;;  %vm1135_vm3 = vcmp.eq.s32.totalorder %v479_v31, 1  ;;  %v369_v63 = vsel %vm368_vm12, 1, %v933_v0  ;;  %vm323_vm6 = vmand %vm1140_vm4, %vm1106_vm10  ;;  %v344_v14 = vsel %vm1140_vm4, 1, %v933_v0 }
  0x43   : > { %vm1148_vm8 = vcmp.eq.s32.totalorder %v442_v32, 1  ;;  %vm1156_vm11 = vcmp.eq.s32.totalorder %v438_v34, 1  ;;  %v377_v17 = vrot.slane %v369_v63, %v1112_v23  ;;  %v324_v18 = vsel %vm323_vm6, 1, %v933_v0 }
  0x44   : > { %vm710_vm10 = vmpackc.low %vm1172_vm13, %vm1156_vm11  ;;  %v373_v31 = vrot.slane %v369_v63, %v1114_v24  ;;  %v393_v32 = vrot.slane %v389_v59, %v1114_v24  ;;  %vm312_vm12 = vcmp.lt.s32.totalorder %v1119_v27, 34  ;;  %v328_v46 = vrot.slane %v324_v18, %v1114_v24 }
  0xfd   : > { %v1086_v7 = vpop.f32.mrf.mxu0 }
  0xfe   : > { %v301_v9 = vmax.f32 %v1086_v7, 0.0 }
  0xff   : > { %v1088_v8 = vpop.f32.mrf.mxu0 }
 0x100   : > { %v302_v10 = vmax.f32 %v1088_v8, 0.0 }
 0x101   : > { %v298_v11 = vpop.f32.mrf.mxu0 }
 0x102   : > { %v807_v12 = vpack.i.bf16 %v302_v10, %v301_v9 }
 0x103   : > { %v299_v13 = vpop.f32.mrf.mxu0 }
 0x104   : > { %808 = vrot.lane.b32.xlu1 %v807_v12, %s934_s29  ;;  %798 = vrot.lane.b32.xlu0 %v807_v12, %s935_s15  ;;  %v397_v13 = vrot.slane %v389_v59, %v1112_v23  ;;  %s702_s15 = sshll.u32 %s1072_s13, 4 }
 0x106   : > { %vm1227_vm4 = vcmp.eq.s32.totalorder %v397_v13, 1 }
 0x108   : > { %813 = vrot.lane.b32.xlu1 %v807_v12, %s936_s16  ;;  %803 = vrot.lane.b32.xlu0 %v807_v12, %s937_s26  ;;  %s240_s16 = scalar_lea.vmem [#allocation5], %s702_s15 }
 0x109   : > { %s624_s26 = sshll.u32 %s240_s16, 4  ;;  %s1308_s26 = int_to_ptr.vmem [resolvable:$true] %s624_s26 }
 0x10a   : > { %s866_s11 = scalar_lea.vmem %s1308_s26, 256 }
 0x10b   : > { %p867_p11 = scmp.ne.s32.totalorder %s1308_s26, %s866_s11 }
 0x10c   : > { %823 = vrot.lane.b32.xlu1 %v807_v12, %s938_s28  ;;  %818 = vrot.lane.b32.xlu0 %v807_v12, %s939_s8  ;;  %s740_s28 = sshll.u32 %s995_s22, 8  ;;  %s943_s22 = smov [#allocation5]  }
 0x10d   : > { %p868_p13 = pnand %p867_p11, %p1402_p12  ;;  %s870_s17 = sshll.u32 %s943_s22, 4  ;;  %s871_s17 = int_to_ptr.vmem [resolvable:$false] %s870_s17 }
 0x10e   : > { %s872_s23 = scalar_lea.vmem %s871_s17, 512  ;;  %p873_p3 = scmp.lt.s32.totalorder %s1308_s26, %s871_s17 }
 0x10f   : > { %p869_p1 = pneg %p868_p13  ;;  %p874_p5 = scmp.lt.s32.totalorder %s872_s23, %s866_s11 }
 0x110   : > { %833 = vrot.lane.b32.xlu1 %v807_v12, %s940_s7  ;;  %828 = vrot.lane.b32.xlu0 %v807_v12, %s941_s9  ;;  %s1313_s9 = scalar_lea.hbm %s1359_s5, %s740_s28 }
 0x111   : > { %p875_p8 = por %p874_p5, %p873_p3 }
 0x113   : > { %p876_p10 = pnand %p875_p8, %p869_p1 }
 0x176   : > { %v809_v35 = vpop.permute.xlu1 %808  ;;  %v799_v36 = vpop.permute.xlu0 %798 }
 0x177   : > { %v801_v41 = vunpack.i.h.bf16 %v799_v36  ;;  %v800_v42 = vunpack.i.l.bf16 %v799_v36  ;;  %v811_v47 = vunpack.i.h.bf16 %v809_v35  ;;  %v810_v48 = vunpack.i.l.bf16 %v809_v35 }
 0x178   : > { %v332_v35 = vrot.slane %v324_v18, %v1112_v23  ;;  %v352_v36 = vrot.slane %v344_v14, %v1112_v23 }
 0x179   : > { %v473_v49 = vsel %vm471_vm1, %v801_v41, %v800_v42  ;;  %v472_v50 = vsel %vm471_vm1, %v800_v42, %v801_v41  ;;  %v453_v1 = vsel %vm451_vm15, %v811_v47, %v810_v48  ;;  %vm707_vm1 = vmpackc.low %vm1152_vm9, %vm1148_vm8  ;;  %v452_v0 = vsel %vm451_vm15, %v810_v48, %v811_v47 }
 0x17a   : > { %v814_v51 = vpop.permute.xlu1 %813  ;;  %v804_v52 = vpop.permute.xlu0 %803  ;;  %v487_v53 = vsel %vm1131_vm2, %v473_v49, 0.0  ;;  %v486_v54 = vsel %vm1135_vm3, %v472_v50, 0.0  ;;  %vm386_vm2 = vcmp.lt.s32.totalorder %v1119_v27, 2  ;;  %vm361_vm3 = vcmp.lt.s32.totalorder %v1119_v27, 30 }
 0x17b   : > { %v806_v57 = vunpack.i.h.bf16 %v804_v52  ;;  %v805_v58 = vunpack.i.l.bf16 %v804_v52  ;;  %v498_v60 = vpack.c.bf16 %v487_v53, %v487_v53  ;;  %v497_v61 = vpack.c.bf16 %v486_v54, %v486_v54 }
 0x17c   : > { %v816_v2 = vunpack.i.h.bf16 %v814_v51  ;;  %v815_v3 = vunpack.i.l.bf16 %v814_v51  ;;  %vm942_vm8 = vmmov 1   ;;  %vm1236_vm9 = vcmp.eq.s32.totalorder %v377_v17, 1 }
 0x17d   : > { %v428_v4 = vsel %vm426_vm5, %v806_v57, %v805_v58  ;;  %706 = vmatprep.subr.msk.bf16.mxu1 %vm503_vm7, %v498_v60  ;;  %v427_v15 = vsel %vm426_vm5, %v805_v58, %v806_v57  ;;  %v505_v25 = vsel %vm503_vm7, %v497_v61, 0  ;;  %vm1217_vm5 = vcmp.eq.s32.totalorder %v413_v62, 1  ;;  %vm713_vm15 = vmpackc.low %vm1191_vm14, %vm942_vm8 }
 0x17e   : > { %v708_v5 = vpack.c.bf16 %v453_v1, %v428_v4  ;;  %v824_v6 = vpop.permute.xlu1 %823  ;;  %v819_v11 = vpop.permute.xlu0 %818  ;;  %v408_v26 = vsel %vm406_vm0, %v816_v2, %v815_v3  ;;  %517 = vmatpush1.bf16.msra.mxu1 %v505_v25  ;;  %v711_v33 = vpack.c.bf16 %v452_v0, %v427_v15  ;;  %v407_v37 = vsel %vm406_vm0, %v815_v3, %v816_v2  ;;  %vm716_vm6 = vmpackc.low %vm1217_vm5, %vm942_vm8  ;;  %v553_v1 = vld [vmem:[%s1358_s4] sm:$0xf] }
 0x17f   : > { %v826_v16 = vunpack.i.h.bf16 %v824_v6  ;;  %v825_v19 = vunpack.i.l.bf16 %v824_v6  ;;  %v821_v20 = vunpack.i.h.bf16 %v819_v11  ;;  %v820_v21 = vunpack.i.l.bf16 %v819_v11  ;;  %vm719_vm11 = vmpackc.low %vm1227_vm4, %vm1236_vm9 }
 0x180   : > { %709 = vmatprep.subr.msk.bf16.mxu1 %vm707_vm1, %v708_v5  ;;  %v714_v38 = vpack.c.bf16 %v408_v26, %v302_v10  ;;  %vm341_vm0 = vcmp.lt.s32.totalorder %v1119_v27, 32  ;;  %vm1260_vm14 = vcmp.eq.s32.totalorder %v373_v31, 1  ;;  %vm1264_vm1 = vcmp.eq.s32.totalorder %v393_v32, 1 }
 0x181   : > { %v387_v39 = vsel %vm386_vm2, %v825_v19, %v826_v16  ;;  %v362_v40 = vsel %vm361_vm3, %v820_v21, %v821_v20  ;;  %v717_v23 = vpack.c.bf16 %v407_v37, %v301_v9  ;;  %vm1274_vm13 = vcmp.eq.s32.totalorder %v352_v36, 1 }
 0x182   : > { %v834_v22 = vpop.permute.xlu1 %833  ;;  %v829_v29 = vpop.permute.xlu0 %828  ;;  %712 = vmatpush1.bf16.msk.msra.mxu1 %vm710_vm10, %v711_v33  ;;  %v348_v47 = vrot.slane %v344_v14, %v1114_v24  ;;  %v388_v48 = vsel %vm386_vm2, %v826_v16, %v825_v19  ;;  %v363_v7 = vsel %vm361_vm3, %v821_v20, %v820_v21  ;;  %v720_v9 = vpack.c.bf16 %v387_v39, %v362_v40  ;;  %vm722_vm10 = vmpackc.low %vm1264_vm1, %vm1260_vm14 }
 0x183   : > { %v836_v41 = vunpack.i.h.bf16 %v834_v22  ;;  %v835_v42 = vunpack.i.l.bf16 %v834_v22  ;;  %v831_v43 = vunpack.i.h.bf16 %v829_v29  ;;  %v830_v44 = vunpack.i.l.bf16 %v829_v29  ;;  %715 = vmatprep.subr.msk.bf16.mxu1 %vm713_vm15, %v714_v38 }
 0x184   : > { %vm334_vm5 = vcmp.eq.s32.totalorder %v332_v35, 1  ;;  %v723_v24 = vpack.c.bf16 %v388_v48, %v363_v7  ;;  %vm333_vm3 = vcmp.eq.s32.totalorder %v328_v46, 1  ;;  %vm353_vm4 = vcmp.eq.s32.totalorder %v348_v47, 1 }
 0x185   : > { %v342_v49 = vsel %vm341_vm0, %v835_v42, %v836_v41  ;;  %v313_v50 = vsel %vm312_vm12, %v830_v44, %v831_v43  ;;  %vm725_vm2 = vmpackc.low %vm1274_vm13, %vm334_vm5  ;;  %v343_v51 = vsel %vm341_vm0, %v836_v41, %v835_v42  ;;  %v314_v52 = vsel %vm312_vm12, %v831_v43, %v830_v44 }
 0x186   : > { %718 = vmatpush1.bf16.msk.msra.mxu1 %vm716_vm6, %v717_v23  ;;  %v726_v53 = vpack.c.bf16 %v342_v49, %v313_v50  ;;  %vm728_vm8 = vmpackc.low %vm353_vm4, %vm333_vm3  ;;  %v729_v54 = vpack.c.bf16 %v343_v51, %v314_v52  ;;  %vm499_vm15 = vcmask 588800   ;;  %vm556_vm9 = vcmask 64512  }
 0x187   : > { %721 = vmatprep.subr.msk.bf16.mxu1 %vm719_vm11, %v720_v9 }
 0x18a   : > { %724 = vmatpush1.bf16.msk.msra.mxu1 %vm722_vm10, %v723_v24 }
 0x18b   : > { %727 = vmatprep.subr.msk.bf16.mxu1 %vm725_vm2, %v726_v53 }
 0x18e   : > { %730 = vmatpush1.bf16.msk.msra.mxu1 %vm728_vm8, %v729_v54 }
 0x191   : > { %731 = vmatmul.mubr.msk.bf16.vlgmr.msra.gmra.mxu1 %vm499_vm15, %v488_v55 }
 0x251   : > { %v544_v56 = vpop.f32.mrf.mxu1 }
 0x252   : > { %v551_v57 = vmax.f32 %v544_v56, 0.0 }
 0x253   : > { %v546_v58 = vpop.f32.mrf.mxu1 }
 0x254   : > { %v554_v59 = vpack.c.bf16 %v551_v57, %v551_v57  ;;  %v552_v27 = vmax.f32 %v546_v58, 0.0 }
 0x255   : > { %v548_v60 = vpop.f32.mrf.mxu1 }
 0x256   : > { %v555_v61 = vpack.c.bf16 %v552_v27, %v552_v27  ;;  %v561_v63 = vsel %vm503_vm7, %v554_v59, 0 }
 0x257   : > { %v549_v62 = vpop.f32.mrf.mxu1 }
 0x258   : > { %732 = vmatprep.subr.msk.bf16.mxu0 %vm503_vm7, %v555_v61 }
 0x259   : > { %581 = vmatpush1.bf16.msra.mxu0 %v561_v63 }
 0x25c   : > { %733 = vmatmul.mubr.msk.bf16.vlgmr.msra.gmra.mxu0 %vm556_vm9, %v553_v1 }
 0x31c   : > { %v600_v2 = vpop.f32.mrf.mxu0 }
 0x31d   : > { %607 = vst [vmem:[%s240_s16] sm:$0xff] %v600_v2 }
 0x31e   : > { %v602_v3 = vpop.f32.mrf.mxu0 }
 0x31f   : > { %608 = vst [vmem:[%s240_s16 + $0x8] sm:$0xff] %v602_v3 }
 0x320   : > { %v604_v4 = vpop.f32.mrf.mxu0 }
 0x321   : > { %879 = shalt.err (!%p876_p10)
}
 0x322   : > { %s880_s25 = scalar_lea.hbm %s1313_s9, 256  ;;  %s884_s14 = scalar_lea.hbm %s1359_s5, 512 }
 0x323   : > { %p881_p2 = scmp.ne.s32.totalorder %s1313_s9, %s880_s25  ;;  %p885_p7 = scmp.lt.s32.totalorder %s1313_s9, %s1359_s5 }
 0x324   : > { %p886_p0 = scmp.lt.s32.totalorder %s884_s14, %s880_s25 }
 0x325   : > { %p882_p4 = pnand %p881_p2, %p1402_p12 }
 0x326   : > { %p887_p6 = por %p886_p0, %p885_p7 }
 0x327   : > { %p883_p9 = pneg %p882_p4 }
 0x329   : > { %p888_p11 = pnand %p887_p6, %p883_p9 }
 0x32b   : > { %891 = shalt.err (!%p888_p11)
}
 0x32c   : > { %743 = dma.vmem_to_hbm [thread:$0]  (%p1402_p12), %s1308_s26, 256, %s1313_s9, %s610_s10   ;;  %v605_v5 = vpop.f32.mrf.mxu0 }
 0x32d PF: > { %s636_s16 = sand.u32 1, %s918_s18   ;;  %p1403_p13 = scmp.ne.s32.totalorder %s1365_s6, 0 }
 0x32e   : > { %p1404_p1 = scmp.ge.s32.totalorder %s930_s21, 2  ;;  %s637_s28 = scalar_lea.sflag [#allocation4], %s636_s16 }
 0x330   : > { %p750_p3 = pnand %p1404_p1, %p1403_p13 }
 0x332   : > { %p751_p5 = pneg %p750_p3 }
 0x334   : > { %913 = dma.done.wait (%p751_p5), %s637_s28, 256  }
 0x335   : > { %915 = vsyncadd (%p751_p5), %s637_s28, 4294967040  ;;  %p18_p8 = scmp.ge.s32.totalorder %s999_s24, 4   ;;  %s1405_s18 = smov %s922_s19 }
 0x336   : > { %s1406_s19 = smov %s926_s20  ;;  %s1407_s20 = smov %s1011_s27 }
 0x337   : > { %s1408_s21 = smov %s999_s24  ;;  %20 = sbr.rel (!%p18_p8) target bundleno = 5 (0x5), region = 86 }
 0x33c   :  { %642 = vsyncpa [#allocation3], 1 }
 0x33d   :  { %644 = vsyncpa [#allocation3 + $0x1], 1 }
 0x33e   :  { %645 = vsyncpa [#allocation4], 1 }
 0x33f   :  { %647 = vsyncpa [#allocation4 + $0x1], 1 }

</bundles_post_ra>
